<compile_context>
chip_gen: v5e
topology: v5e:2x2
jax: 0.10.0
libtpu: 0.0.40
codegen_flags: <defaults>
</compile_context>

<pallas_src>
import functools

import jax
import jax.numpy as jnp
from jax.experimental import pallas as pl
from jax.experimental.pallas import tpu as pltpu


def _round_up(x, m):
    return (x + m - 1) // m * m


def _tpu_vmem_bytes():
    """Per-core VMEM capacity; conservative 64 MiB (v7x-sized) fallback."""
    try:
        return int(pltpu.get_tpu_info().vmem_capacity_bytes)
    except Exception:
        return 64 << 20


# ----------------------------------------------------------------------------
# Fused kernel: all L sub-layers for a tb-element batch tile.
# ----------------------------------------------------------------------------
def _gin_fused_kernel(selfw_ref, x_ref, adj_ref, w_ref, b_ref, o_ref):
    """selfw_ref: (L,)         SMEM f32   (1 + eps_l)
       x_ref    : (tb, Np, Hp) VMEM f32
       adj_ref  : (tb, Np, Np) VMEM bf16
       w_ref    : (L, Hp, Hp)  VMEM bf16  (untiled, single resident copy)
       b_ref    : (L, 1, Hp)   VMEM f32   (untiled, single resident copy)
       o_ref    : (tb, Np, Hp) VMEM f32
    """
    tb, n, hp = x_ref.shape
    n_sub = w_ref.shape[0]

    h = x_ref[...]                                           # (tb, Np, Hp) f32
    for l in range(n_sub):                                   # static unroll, L=4
        # GIN sum aggregation on the MXU: bf16 x bf16 -> f32 accumulate.
        # adj is re-read from its VMEM tile every layer (short live range).
        agg = jnp.einsum("bnm,bmh->bnh", adj_ref[...], h.astype(jnp.bfloat16),
                         preferred_element_type=jnp.float32)
        z = agg + selfw_ref[l] * h                           # (1 + eps_l) self loop
        # Lane-dense Linear over all tb*Np rows: bf16 operands, f32 accumulate.
        z = z.reshape(tb * n, hp).astype(jnp.bfloat16)
        z = jnp.dot(z, w_ref[l], preferred_element_type=jnp.float32)
        z = z + b_ref[l]
        h = jnp.maximum(z, 0.0).reshape(tb, n, hp)           # ReLU

    o_ref[...] = h.astype(o_ref.dtype)


def _fused_step_bytes(tb, n_pad, h_pad, n_sub):
    adj = tb * n_pad * n_pad * 2                      # bf16 adjacency block
    xio = 2 * tb * n_pad * h_pad * 4                  # x block + out block, f32
    params = n_sub * h_pad * h_pad * 2 + n_sub * h_pad * 4   # resident W (bf16) + b (f32)
    return 2 * (adj + xio) + params                   # only I/O is double-buffered


def _pick_tb(bs, n_pad, h_pad, n_sub, vmem_budget, prefer_two_steps):
    divs = [d for d in range(1, bs + 1) if bs % d == 0]
    fits = [d for d in divs
            if _fused_step_bytes(d, n_pad, h_pad, n_sub) <= vmem_budget]
    if not fits:
        return 1
    if prefer_two_steps:                               # keep both v7x TCs fed
        two = [d for d in fits if bs // d >= 2]
        if two:
            fits = two
    # Smallest tile that already gives >= 512 MXU M rows per step, else max.
    enough = [d for d in fits if d * n_pad >= 512]
    return min(enough) if enough else max(fits)


def _forward_fused(x, adj, weights, biases, eps, small_vmem, budget):
    bs, n, h = x.shape
    n_sub = weights.shape[0]
    n_pad = _round_up(n, 16)          # bf16 packs two rows per sublane
    h_pad = _round_up(h, 128)         # lane-dense

    x_p = jnp.pad(x, ((0, 0), (0, n_pad - n), (0, h_pad - h))).astype(jnp.float32)
    adj_p = jnp.pad(adj, ((0, 0), (0, n_pad - n), (0, n_pad - n))).astype(jnp.bfloat16)
    w_p = jnp.pad(weights, ((0, 0), (0, h_pad - h), (0, h_pad - h))).astype(jnp.bfloat16)
    b_p = jnp.pad(biases, ((0, 0), (0, 0), (0, h_pad - h))).astype(jnp.float32)
    self_w = (1.0 + eps).astype(jnp.float32)

    tb = _pick_tb(bs, n_pad, h_pad, n_sub, budget, prefer_two_steps=small_vmem)
    grid = (bs // tb,)

    step_bytes = _fused_step_bytes(tb, n_pad, h_pad, n_sub)
    vmem_limit = int(min(max(step_bytes + (6 << 20), 16 << 20),
                         (56 << 20) if small_vmem else (100 << 20)))

    flops = bs * n_sub * (2 * n_pad * n_pad * h_pad + 2 * n_pad * h_pad * h_pad)
    bytes_accessed = (x_p.size * 4 + adj_p.size * 2 + w_p.size * 2
                      + b_p.size * 4 + bs * n_pad * h_pad * 4)

    out_p = pl.pallas_call(
        _gin_fused_kernel,
        out_shape=jax.ShapeDtypeStruct((bs, n_pad, h_pad), jnp.float32),
        grid=grid,
        in_specs=[
            pl.BlockSpec(memory_space=pltpu.MemorySpace.SMEM),       # 1 + eps
            pl.BlockSpec((tb, n_pad, h_pad), lambda i: (i, 0, 0)),   # x
            pl.BlockSpec((tb, n_pad, n_pad), lambda i: (i, 0, 0)),   # adj
            pl.BlockSpec(memory_space=pltpu.MemorySpace.VMEM),       # weights (bf16)
            pl.BlockSpec(memory_space=pltpu.MemorySpace.VMEM),       # biases  (f32)
        ],
        out_specs=pl.BlockSpec((tb, n_pad, h_pad), lambda i: (i, 0, 0)),
        compiler_params=pltpu.CompilerParams(
            dimension_semantics=("parallel",),
            vmem_limit_bytes=vmem_limit),
        cost_estimate=pl.CostEstimate(
            flops=flops, transcendentals=0, bytes_accessed=bytes_accessed),
    )(self_w, x_p, adj_p, w_p, b_p)

    return out_p[:, :n, :h]


# ----------------------------------------------------------------------------
# Row-tiled per-layer fallback for large N (adj streamed block-by-block).
# ----------------------------------------------------------------------------
def _gin_layer_rowtiled_kernel(selfw_ref, adj_ref, hall_ref, hrow_ref,
                               w_ref, b_ref, o_ref):
    """selfw_ref: (1,)          SMEM f32  (1 + eps)
       adj_ref  : (1, tm, Np)   VMEM bf16 (row block of adj)
       hall_ref : (1, Np, Hp)   VMEM f32  (full node features, this batch elem)
       hrow_ref : (1, tm, Hp)   VMEM f32  (row block of h, for the self loop)
       w_ref    : (Hp, Hp)      VMEM bf16
       b_ref    : (1, Hp)       VMEM f32
       o_ref    : (1, tm, Hp)   VMEM f32
    """
    agg = jnp.dot(adj_ref[0], hall_ref[0].astype(jnp.bfloat16),
                  preferred_element_type=jnp.float32)            # (tm, Hp)
    z = agg + selfw_ref[0] * hrow_ref[0]
    z = jnp.dot(z.astype(jnp.bfloat16), w_ref[...],
                preferred_element_type=jnp.float32) + b_ref[...]
    o_ref[0] = jnp.maximum(z, 0.0)


def _forward_rowtiled(x, adj, weights, biases, eps, small_vmem):
    bs, n, h = x.shape
    n_sub = weights.shape[0]
    h_pad = _round_up(h, 128)
    n_pad16 = _round_up(n, 16)
    tm = min(256, n_pad16)                       # MXU-sized node-row block
    n_pad = _round_up(n, tm)

    x_p = jnp.pad(x, ((0, 0), (0, n_pad - n), (0, h_pad - h))).astype(jnp.float32)
    adj_p = jnp.pad(adj, ((0, 0), (0, n_pad - n), (0, n_pad - n))).astype(jnp.bfloat16)
    w_p = jnp.pad(weights, ((0, 0), (0, h_pad - h), (0, h_pad - h))).astype(jnp.bfloat16)
    b_p = jnp.pad(biases, ((0, 0), (0, 0), (0, h_pad - h))).astype(jnp.float32)
    self_w = (1.0 + eps).astype(jnp.float32)

    step = (2 * (tm * n_pad * 2 + n_pad * h_pad * 4 + 2 * tm * h_pad * 4)
            + h_pad * h_pad * 2 + h_pad * 4)
    vmem_limit = int(min(max(step + (6 << 20), 16 << 20),
                         (56 << 20) if small_vmem else (100 << 20)))

    grid = (bs, n_pad // tm)
    flops_l = bs * (2 * n_pad * n_pad * h_pad + 2 * n_pad * h_pad * h_pad)
    bytes_l = (adj_p.size * 2 + 2 * bs * n_pad * h_pad * 4
               + h_pad * h_pad * 2 + h_pad * 4)

    h_cur = x_p
    for l in range(n_sub):
        h_cur = pl.pallas_call(
            _gin_layer_rowtiled_kernel,
            out_shape=jax.ShapeDtypeStruct((bs, n_pad, h_pad), jnp.float32),
            grid=grid,
            in_specs=[
                pl.BlockSpec(memory_space=pltpu.MemorySpace.SMEM),         # 1+eps_l
                pl.BlockSpec((1, tm, n_pad), lambda b, r: (b, r, 0)),      # adj rows
                pl.BlockSpec((1, n_pad, h_pad), lambda b, r: (b, 0, 0)),   # full h
                pl.BlockSpec((1, tm, h_pad), lambda b, r: (b, r, 0)),      # h row blk
                pl.BlockSpec(memory_space=pltpu.MemorySpace.VMEM),         # W_l (bf16)
                pl.BlockSpec(memory_space=pltpu.MemorySpace.VMEM),         # b_l (f32)
            ],
            out_specs=pl.BlockSpec((1, tm, h_pad), lambda b, r: (b, r, 0)),
            compiler_params=pltpu.CompilerParams(
                dimension_semantics=("parallel", "parallel"),
                vmem_limit_bytes=vmem_limit),
            cost_estimate=pl.CostEstimate(
                flops=flops_l, transcendentals=0, bytes_accessed=bytes_l),
        )(self_w[l].reshape(1), adj_p, h_cur, h_cur, w_p[l], b_p[l])

    return h_cur[:, :n, :h]


# ----------------------------------------------------------------------------
# Dispatch wrapper.
# ----------------------------------------------------------------------------
@functools.partial(jax.jit, static_argnames=("force_rowtiled",))
def gin_plain_encoder(x, adj, weights, biases, eps, force_rowtiled=False):
    """x: [bs, N, H], adj: [bs, N, N], weights: [L, H, H],
    biases: [L, 1, H], eps: [L]."""
    bs, n, h = x.shape
    n_sub = weights.shape[0]
    n_pad = _round_up(n, 16)
    h_pad = _round_up(h, 128)

    vmem_cap = _tpu_vmem_bytes()
    small_vmem = vmem_cap < (100 << 20)                # v7x-like: 64 MiB, 2 TCs
    budget = (44 << 20) if small_vmem else (96 << 20)  # tile budget per step

    fused_fits = _fused_step_bytes(1, n_pad, h_pad, n_sub) <= budget
    if force_rowtiled or not fused_fits:
        return _forward_rowtiled(x, adj, weights, biases, eps, small_vmem)
    return _forward_fused(x, adj, weights, biases, eps, small_vmem, budget)


# ----------------------------------------------------------------------------
# Params / references / test.
# ----------------------------------------------------------------------------
def init_params(key, hidden_dim, n_encoder_layers=2, n_sub_per_block=2):
    """nn.Linear default init (uniform +-1/sqrt(fan_in)); GIN eps init 0."""
    L = n_encoder_layers * n_sub_per_block
    kw, kb = jax.random.split(key)
    bound = 1.0 / float(hidden_dim) ** 0.5
    weights = jax.random.uniform(kw, (L, hidden_dim, hidden_dim),
                                 jnp.float32, -bound, bound)
    biases = jax.random.uniform(kb, (L, 1, hidden_dim),
                                jnp.float32, -bound, bound)
    eps = jnp.zeros((L,), jnp.float32)
    return weights, biases, eps


def reference_forward(x, adj, weights, biases, eps):
    """Pure-JAX reference matching kernel MXU precision (bf16 operands, f32 acc)."""
    h = x.astype(jnp.float32)
    adj_bf = adj.astype(jnp.bfloat16)
    for l in range(weights.shape[0]):
        agg = jnp.einsum("bnm,bmh->bnh", adj_bf, h.astype(jnp.bfloat16),
                         preferred_element_type=jnp.float32)
        z = agg + (1.0 + eps[l]) * h
        z = jnp.einsum("bnh,hk->bnk", z.astype(jnp.bfloat16),
                       weights[l].astype(jnp.bfloat16),
                       preferred_element_type=jnp.float32) + biases[l]
        h = jnp.maximum(z, 0.0)
    return h


def reference_forward_f32(x, adj, weights, biases, eps):
    """True f32 forward (what the PyTorch module computes)."""
    h = x.astype(jnp.float32)
    for l in range(weights.shape[0]):
        agg = jnp.einsum("bnm,bmh->bnh", adj.astype(jnp.float32), h)
        z = agg + (1.0 + eps[l]) * h
        z = jnp.einsum("bnh,hk->bnk", z, weights[l]) + biases[l]
        h = jnp.maximum(z, 0.0)
    return h


if __name__ == "__main__":
    bs, n_node, hidden_dim = 8, 16, 32

    key = jax.random.PRNGKey(0)
    kx, kadj, kp = jax.random.split(key, 3)

    x = jax.random.normal(kx, (bs, n_node, hidden_dim), jnp.float32)
    # Random symmetric 0/1 adjacency with self loops (module accepts any
    # [bs, n_node, n_node] tensor; bf16 shipping is exact for 0/1 entries).
    a = (jax.random.uniform(kadj, (bs, n_node, n_node)) > 0.5).astype(jnp.float32)
    adj = jnp.clip(a + jnp.swapaxes(a, 1, 2) + jnp.eye(n_node)[None], 0.0, 1.0)

    weights, biases, eps = init_params(kp, hidden_dim)

    out_fused = jax.block_until_ready(
        gin_plain_encoder(x, adj, weights, biases, eps))
    out_tiled = jax.block_until_ready(
        gin_plain_encoder(x, adj, weights, biases, eps, force_rowtiled=True))

    ref_bf = reference_forward(x, adj, weights, biases, eps)
    ref_f32 = reference_forward_f32(x, adj, weights, biases, eps)

    assert out_fused.shape == (bs, n_node, hidden_dim)
    assert out_tiled.shape == (bs, n_node, hidden_dim)
    # Contract check: kernels vs matched-precision (bf16-MXU) reference.
    assert jnp.allclose(out_fused, ref_bf, atol=1e-2, rtol=1e-2), \
        float(jnp.max(jnp.abs(out_fused - ref_bf)))
    assert jnp.allclose(out_tiled, ref_bf, atol=1e-2, rtol=1e-2), \
        float(jnp.max(jnp.abs(out_tiled - ref_bf)))
    # Sanity vs true f32 forward (bf16-MXU quantization accumulates over the
    # 4 sub-layers, so only a loose norm-relative bound is asserted here).
    rel = float(jnp.linalg.norm(out_fused - ref_f32) /
                (jnp.linalg.norm(ref_f32) + 1e-6))
    assert rel < 0.25, rel

    print("KERNEL_OK")
</pallas_src>

<mosaic_0001>
module attributes {stable_mosaic.version = 11 : i64} {
  func.func @_gin_fused_kernel(%arg0: i32, %arg1: memref<4xf32, #tpu.memory_space<smem>>, %arg2: memref<4x16x128xf32, #tpu.memory_space<vmem>>, %arg3: memref<4x16x16xbf16, #tpu.memory_space<vmem>>, %arg4: memref<4x128x128xbf16, #tpu.memory_space<vmem>>, %arg5: memref<4x1x128xf32, #tpu.memory_space<vmem>>, %arg6: memref<4x16x128xf32, #tpu.memory_space<vmem>>) attributes {dimension_semantics = [#tpu.dimension_semantics<parallel>], iteration_bounds = array<i64: 2>, scalar_prefetch = 0 : i64, scratch_operands = 0 : i64, tpu.core_type = #tpu.core_type<tc>, window_params = [{transform_indices = @transform_0, window_bounds = array<i64: 4>}, {transform_indices = @transform_1, window_bounds = array<i64: 4, 16, 128>}, {transform_indices = @transform_2, window_bounds = array<i64: 4, 16, 16>}, {pipeline_mode = #tpu.pipeline_mode<synchronous>, transform_indices = @transform_3, window_bounds = array<i64: 4, 128, 128>}, {pipeline_mode = #tpu.pipeline_mode<synchronous>, transform_indices = @transform_4, window_bounds = array<i64: 4, 1, 128>}, {transform_indices = @transform_5, window_bounds = array<i64: 4, 16, 128>}]} {
    %c0 = arith.constant 0 : index
    %c0_0 = arith.constant 0 : index
    %c0_1 = arith.constant 0 : index
    %0 = vector.load %arg2[%c0, %c0_0, %c0_1] : memref<4x16x128xf32, #tpu.memory_space<vmem>>, vector<4x16x128xf32>
    %c0_2 = arith.constant 0 : index
    %c0_3 = arith.constant 0 : index
    %c0_4 = arith.constant 0 : index
    %1 = vector.load %arg3[%c0_2, %c0_3, %c0_4] : memref<4x16x16xbf16, #tpu.memory_space<vmem>>, vector<4x16x16xbf16>
    %2 = arith.truncf %0 : vector<4x16x128xf32> to vector<4x16x128xbf16>
    "tpu.trace_start"() <{level = 10 : i32, message = "bnm,bmh->bnh"}> : () -> ()
    %cst = arith.constant dense<0.000000e+00> : vector<4x16x128xf32>
    %3 = tpu.matmul %1, %2, %cst {dimension_numbers = #tpu.dot_dimension_numbers<[2], [1], [1], [2], [0, 0, 0, 1, 1, 2], [0], [0]>} : vector<4x16x16xbf16>, vector<4x16x128xbf16>, vector<4x16x128xf32> -> vector<4x16x128xf32>
    "tpu.trace_stop"() : () -> ()
    %c0_5 = arith.constant 0 : index
    %4 = memref.load %arg1[%c0_5] : memref<4xf32, #tpu.memory_space<smem>>
    %5 = vector.broadcast %4 : f32 to vector<4x16x128xf32>
    %6 = arith.mulf %5, %0 : vector<4x16x128xf32>
    %7 = arith.addf %3, %6 : vector<4x16x128xf32>
    %8 = vector.shape_cast %7 : vector<4x16x128xf32> to vector<64x128xf32>
    %9 = arith.truncf %8 : vector<64x128xf32> to vector<64x128xbf16>
    %c0_6 = arith.constant 0 : index
    %c0_7 = arith.constant 0 : index
    %c0_8 = arith.constant 0 : index
    %10 = vector.load %arg4[%c0_6, %c0_7, %c0_8] : memref<4x128x128xbf16, #tpu.memory_space<vmem>>, vector<1x128x128xbf16>
    %11 = vector.shape_cast %10 : vector<1x128x128xbf16> to vector<128x128xbf16>
    %cst_9 = arith.constant dense<0.000000e+00> : vector<64x128xf32>
    %12 = tpu.matmul %9, %11, %cst_9 {dimension_numbers = #tpu.dot_dimension_numbers<[1], [0], [0], [1], [0, 0, 1, 1], [], []>} : vector<64x128xbf16>, vector<128x128xbf16>, vector<64x128xf32> -> vector<64x128xf32>
    %c0_10 = arith.constant 0 : index
    %c0_11 = arith.constant 0 : index
    %c0_12 = arith.constant 0 : index
    %13 = vector.load %arg5[%c0_10, %c0_11, %c0_12] : memref<4x1x128xf32, #tpu.memory_space<vmem>>, vector<1x1x128xf32>
    %14 = vector.shape_cast %13 : vector<1x1x128xf32> to vector<1x128xf32>
    %15 = vector.broadcast %14 : vector<1x128xf32> to vector<64x128xf32>
    %16 = arith.addf %12, %15 : vector<64x128xf32>
    %cst_13 = arith.constant 0.000000e+00 : f32
    %17 = vector.broadcast %cst_13 : f32 to vector<64x128xf32>
    %18 = arith.maximumf %16, %17 : vector<64x128xf32>
    %19 = vector.shape_cast %18 : vector<64x128xf32> to vector<4x16x128xf32>
    %c0_14 = arith.constant 0 : index
    %c0_15 = arith.constant 0 : index
    %c0_16 = arith.constant 0 : index
    %20 = vector.load %arg3[%c0_14, %c0_15, %c0_16] : memref<4x16x16xbf16, #tpu.memory_space<vmem>>, vector<4x16x16xbf16>
    %21 = arith.truncf %19 : vector<4x16x128xf32> to vector<4x16x128xbf16>
    "tpu.trace_start"() <{level = 10 : i32, message = "bnm,bmh->bnh"}> : () -> ()
    %cst_17 = arith.constant dense<0.000000e+00> : vector<4x16x128xf32>
    %22 = tpu.matmul %20, %21, %cst_17 {dimension_numbers = #tpu.dot_dimension_numbers<[2], [1], [1], [2], [0, 0, 0, 1, 1, 2], [0], [0]>} : vector<4x16x16xbf16>, vector<4x16x128xbf16>, vector<4x16x128xf32> -> vector<4x16x128xf32>
    "tpu.trace_stop"() : () -> ()
    %c1 = arith.constant 1 : index
    %23 = memref.load %arg1[%c1] : memref<4xf32, #tpu.memory_space<smem>>
    %24 = vector.broadcast %23 : f32 to vector<4x16x128xf32>
    %25 = arith.mulf %24, %19 : vector<4x16x128xf32>
    %26 = arith.addf %22, %25 : vector<4x16x128xf32>
    %27 = vector.shape_cast %26 : vector<4x16x128xf32> to vector<64x128xf32>
    %28 = arith.truncf %27 : vector<64x128xf32> to vector<64x128xbf16>
    %c1_18 = arith.constant 1 : index
    %c0_19 = arith.constant 0 : index
    %c0_20 = arith.constant 0 : index
    %29 = vector.load %arg4[%c1_18, %c0_19, %c0_20] : memref<4x128x128xbf16, #tpu.memory_space<vmem>>, vector<1x128x128xbf16>
    %30 = vector.shape_cast %29 : vector<1x128x128xbf16> to vector<128x128xbf16>
    %cst_21 = arith.constant dense<0.000000e+00> : vector<64x128xf32>
    %31 = tpu.matmul %28, %30, %cst_21 {dimension_numbers = #tpu.dot_dimension_numbers<[1], [0], [0], [1], [0, 0, 1, 1], [], []>} : vector<64x128xbf16>, vector<128x128xbf16>, vector<64x128xf32> -> vector<64x128xf32>
    %c1_22 = arith.constant 1 : index
    %c0_23 = arith.constant 0 : index
    %c0_24 = arith.constant 0 : index
    %32 = vector.load %arg5[%c1_22, %c0_23, %c0_24] : memref<4x1x128xf32, #tpu.memory_space<vmem>>, vector<1x1x128xf32>
    %33 = vector.shape_cast %32 : vector<1x1x128xf32> to vector<1x128xf32>
    %34 = vector.broadcast %33 : vector<1x128xf32> to vector<64x128xf32>
    %35 = arith.addf %31, %34 : vector<64x128xf32>
    %cst_25 = arith.constant 0.000000e+00 : f32
    %36 = vector.broadcast %cst_25 : f32 to vector<64x128xf32>
    %37 = arith.maximumf %35, %36 : vector<64x128xf32>
    %38 = vector.shape_cast %37 : vector<64x128xf32> to vector<4x16x128xf32>
    %c0_26 = arith.constant 0 : index
    %c0_27 = arith.constant 0 : index
    %c0_28 = arith.constant 0 : index
    %39 = vector.load %arg3[%c0_26, %c0_27, %c0_28] : memref<4x16x16xbf16, #tpu.memory_space<vmem>>, vector<4x16x16xbf16>
    %40 = arith.truncf %38 : vector<4x16x128xf32> to vector<4x16x128xbf16>
    "tpu.trace_start"() <{level = 10 : i32, message = "bnm,bmh->bnh"}> : () -> ()
    %cst_29 = arith.constant dense<0.000000e+00> : vector<4x16x128xf32>
    %41 = tpu.matmul %39, %40, %cst_29 {dimension_numbers = #tpu.dot_dimension_numbers<[2], [1], [1], [2], [0, 0, 0, 1, 1, 2], [0], [0]>} : vector<4x16x16xbf16>, vector<4x16x128xbf16>, vector<4x16x128xf32> -> vector<4x16x128xf32>
    "tpu.trace_stop"() : () -> ()
    %c2 = arith.constant 2 : index
    %42 = memref.load %arg1[%c2] : memref<4xf32, #tpu.memory_space<smem>>
    %43 = vector.broadcast %42 : f32 to vector<4x16x128xf32>
    %44 = arith.mulf %43, %38 : vector<4x16x128xf32>
    %45 = arith.addf %41, %44 : vector<4x16x128xf32>
    %46 = vector.shape_cast %45 : vector<4x16x128xf32> to vector<64x128xf32>
    %47 = arith.truncf %46 : vector<64x128xf32> to vector<64x128xbf16>
    %c2_30 = arith.constant 2 : index
    %c0_31 = arith.constant 0 : index
    %c0_32 = arith.constant 0 : index
    %48 = vector.load %arg4[%c2_30, %c0_31, %c0_32] : memref<4x128x128xbf16, #tpu.memory_space<vmem>>, vector<1x128x128xbf16>
    %49 = vector.shape_cast %48 : vector<1x128x128xbf16> to vector<128x128xbf16>
    %cst_33 = arith.constant dense<0.000000e+00> : vector<64x128xf32>
    %50 = tpu.matmul %47, %49, %cst_33 {dimension_numbers = #tpu.dot_dimension_numbers<[1], [0], [0], [1], [0, 0, 1, 1], [], []>} : vector<64x128xbf16>, vector<128x128xbf16>, vector<64x128xf32> -> vector<64x128xf32>
    %c2_34 = arith.constant 2 : index
    %c0_35 = arith.constant 0 : index
    %c0_36 = arith.constant 0 : index
    %51 = vector.load %arg5[%c2_34, %c0_35, %c0_36] : memref<4x1x128xf32, #tpu.memory_space<vmem>>, vector<1x1x128xf32>
    %52 = vector.shape_cast %51 : vector<1x1x128xf32> to vector<1x128xf32>
    %53 = vector.broadcast %52 : vector<1x128xf32> to vector<64x128xf32>
    %54 = arith.addf %50, %53 : vector<64x128xf32>
    %cst_37 = arith.constant 0.000000e+00 : f32
    %55 = vector.broadcast %cst_37 : f32 to vector<64x128xf32>
    %56 = arith.maximumf %54, %55 : vector<64x128xf32>
    %57 = vector.shape_cast %56 : vector<64x128xf32> to vector<4x16x128xf32>
    %c0_38 = arith.constant 0 : index
    %c0_39 = arith.constant 0 : index
    %c0_40 = arith.constant 0 : index
    %58 = vector.load %arg3[%c0_38, %c0_39, %c0_40] : memref<4x16x16xbf16, #tpu.memory_space<vmem>>, vector<4x16x16xbf16>
    %59 = arith.truncf %57 : vector<4x16x128xf32> to vector<4x16x128xbf16>
    "tpu.trace_start"() <{level = 10 : i32, message = "bnm,bmh->bnh"}> : () -> ()
    %cst_41 = arith.constant dense<0.000000e+00> : vector<4x16x128xf32>
    %60 = tpu.matmul %58, %59, %cst_41 {dimension_numbers = #tpu.dot_dimension_numbers<[2], [1], [1], [2], [0, 0, 0, 1, 1, 2], [0], [0]>} : vector<4x16x16xbf16>, vector<4x16x128xbf16>, vector<4x16x128xf32> -> vector<4x16x128xf32>
    "tpu.trace_stop"() : () -> ()
    %c3 = arith.constant 3 : index
    %61 = memref.load %arg1[%c3] : memref<4xf32, #tpu.memory_space<smem>>
    %62 = vector.broadcast %61 : f32 to vector<4x16x128xf32>
    %63 = arith.mulf %62, %57 : vector<4x16x128xf32>
    %64 = arith.addf %60, %63 : vector<4x16x128xf32>
    %65 = vector.shape_cast %64 : vector<4x16x128xf32> to vector<64x128xf32>
    %66 = arith.truncf %65 : vector<64x128xf32> to vector<64x128xbf16>
    %c3_42 = arith.constant 3 : index
    %c0_43 = arith.constant 0 : index
    %c0_44 = arith.constant 0 : index
    %67 = vector.load %arg4[%c3_42, %c0_43, %c0_44] : memref<4x128x128xbf16, #tpu.memory_space<vmem>>, vector<1x128x128xbf16>
    %68 = vector.shape_cast %67 : vector<1x128x128xbf16> to vector<128x128xbf16>
    %cst_45 = arith.constant dense<0.000000e+00> : vector<64x128xf32>
    %69 = tpu.matmul %66, %68, %cst_45 {dimension_numbers = #tpu.dot_dimension_numbers<[1], [0], [0], [1], [0, 0, 1, 1], [], []>} : vector<64x128xbf16>, vector<128x128xbf16>, vector<64x128xf32> -> vector<64x128xf32>
    %c3_46 = arith.constant 3 : index
    %c0_47 = arith.constant 0 : index
    %c0_48 = arith.constant 0 : index
    %70 = vector.load %arg5[%c3_46, %c0_47, %c0_48] : memref<4x1x128xf32, #tpu.memory_space<vmem>>, vector<1x1x128xf32>
    %71 = vector.shape_cast %70 : vector<1x1x128xf32> to vector<1x128xf32>
    %72 = vector.broadcast %71 : vector<1x128xf32> to vector<64x128xf32>
    %73 = arith.addf %69, %72 : vector<64x128xf32>
    %cst_49 = arith.constant 0.000000e+00 : f32
    %74 = vector.broadcast %cst_49 : f32 to vector<64x128xf32>
    %75 = arith.maximumf %73, %74 : vector<64x128xf32>
    %76 = vector.shape_cast %75 : vector<64x128xf32> to vector<4x16x128xf32>
    %c0_50 = arith.constant 0 : index
    %c0_51 = arith.constant 0 : index
    %c0_52 = arith.constant 0 : index
    %77 = vector.load %arg6[%c0_50, %c0_51, %c0_52] : memref<4x16x128xf32, #tpu.memory_space<vmem>>, vector<4x16x128xf32>
    tpu.vector_store %arg6[%c0_50, %c0_51, %c0_52], %76 {strides = array<i32>} : memref<4x16x128xf32, #tpu.memory_space<vmem>>, vector<4x16x128xf32>,
    return
  }
  func.func @transform_0(%arg0: i32) -> i32 {
    %c0_i32 = arith.constant 0 : i32
    %c0_i32_0 = arith.constant 0 : i32
    return %c0_i32 : i32
  }
  func.func @transform_1(%arg0: i32) -> (i32, i32, i32) {
    %c0_i32 = arith.constant 0 : i32
    %c0_i32_0 = arith.constant 0 : i32
    %c0_i32_1 = arith.constant 0 : i32
    return %arg0, %c0_i32, %c0_i32_0 : i32, i32, i32
  }
  func.func @transform_2(%arg0: i32) -> (i32, i32, i32) {
    %c0_i32 = arith.constant 0 : i32
    %c0_i32_0 = arith.constant 0 : i32
    %c0_i32_1 = arith.constant 0 : i32
    return %arg0, %c0_i32, %c0_i32_0 : i32, i32, i32
  }
  func.func @transform_3(%arg0: i32) -> (i32, i32, i32) {
    %c0_i32 = arith.constant 0 : i32
    %c0_i32_0 = arith.constant 0 : i32
    %c0_i32_1 = arith.constant 0 : i32
    %c0_i32_2 = arith.constant 0 : i32
    return %c0_i32, %c0_i32_0, %c0_i32_1 : i32, i32, i32
  }
  func.func @transform_4(%arg0: i32) -> (i32, i32, i32) {
    %c0_i32 = arith.constant 0 : i32
    %c0_i32_0 = arith.constant 0 : i32
    %c0_i32_1 = arith.constant 0 : i32
    %c0_i32_2 = arith.constant 0 : i32
    return %c0_i32, %c0_i32_0, %c0_i32_1 : i32, i32, i32
  }
  func.func @transform_5(%arg0: i32) -> (i32, i32, i32) {
    %c0_i32 = arith.constant 0 : i32
    %c0_i32_0 = arith.constant 0 : i32
    %c0_i32_1 = arith.constant 0 : i32
    return %arg0, %c0_i32, %c0_i32_0 : i32, i32, i32
  }
}

</mosaic_0001>

<bundles_post_ra>
// kernel: gin_plain_encoder.1
= control target key start
LH: loop header
LB: loop body
LE: loop exit
PB: predicated region body
PF: predicated region fallthrough
CT: control target
= control target key end

     0   :  { %10 = vsyncpa [#allocation4], 0  ;;  %s2239_s0 = inlined_call_operand.vmem [shape: f32[4], index: 0, kind: input, shape index: {}]   ;;  %s2240_s1 = inlined_call_operand.vmem [shape: f32[8,16,128], index: 1, kind: input, shape index: {}]   ;;  %s2241_s2 = inlined_call_operand.vmem [shape: bf16[8,16,16], index: 2, kind: input, shape index: {}]   ;;  %s2242_s3 = inlined_call_operand.vmem [shape: bf16[4,128,128], index: 3, kind: input, shape index: {}]   ;;  %s2243_s4 = inlined_call_operand.vmem [shape: f32[4,1,128], index: 4, kind: input, shape index: {}]   ;;  %s2244_s5 = inlined_call_operand.hbm [shape: f32[8,16,128], index: 5, kind: output, shape index: {}]  }
   0x1   :  { %11 = vsyncpa [#allocation3], 0 }
   0x2   :  { %13 = vsyncpa [#allocation3 + $0x1], 0  ;;  %s1896_s18 = smov 0   ;;  %s1898_s19 = smov 0  }
   0x3   :  { %s1900_s20 = smov 0   ;;  %s1902_s21 = smov 0  }
   0x4 LB: > { %s1917_s22 = sadd.s32 4294967295, %s1861_s21   ;;  %s1383_s23 = sadd.s32 4294967294, %s1861_s21   ;;  %s1861_s21 = sphi %s1902_s21, %s2250_s21   ;;  %s1857_s20 = sphi %s1900_s20, %s2249_s20   ;;  %s1853_s19 = sphi %s1898_s19, %s2248_s19   ;;  %s1849_s18 = sphi %s1896_s18, %s2247_s18  }
   0x5   : > { %s1921_s24 = sadd.s32 1, %s1861_s21   ;;  %s141_s25 = sadd.s32 1, %s1857_s20 }
   0x6   : > { %s138_s26 = ssub.s32 %s1861_s21, %s1921_s24  ;;  %p151_p0 = scmp.ne.s32.totalorder %s1857_s20, %s1853_s19 }
   0x7   : > { %p139_p1 = scmp.eq.s32.totalorder %s138_s26, 0  ;;  %p152_p2 = scmp.eq.s32.totalorder %s1917_s22, 1 }
   0x8   : > { %p157_p3 = scmp.ne.s32.totalorder %s1853_s19, %s1849_s18  ;;  %p158_p4 = scmp.eq.s32.totalorder %s1383_s23, 1 }
   0x9   : > { %s1932_s27 = scalar_select %p139_p1, %s1857_s20, %s141_s25  }
   0xa   : > { %p1934_p5 = por %p152_p2, %p151_p0  ;;  %p1938_p6 = por %p158_p4, %p157_p3 }
   0xb   : > { %p1384_p7 = scmp.ge.s32.totalorder %s1861_s21, 1  ;;  %p165_p8 = scmp.lt.s32.totalorder %s1861_s21, 3 }
   0xc   : > { %p1738_p9 = scmp.eq.s32.totalorder %s1917_s22, 0  ;;  %s177_s7 = sshll.u32 %s2239_s0, 4  ;;  %s178_s7 = int_to_ptr.vmem [resolvable:$true] %s177_s7 }
   0xd   : > { %p166_p10 = pnand %p1384_p7, %p165_p8  ;;  %s1863_s8 = smov [#allocation2]  }
   0xf   : > { %p1730_p11 = pneg %p166_p10  ;;  %216 = sbr.rel (%p166_p10) target bundleno = 1252 (0x4e4), region = 40 }
  0x11   : > { %p1731_p12 = pnand %p1738_p9, %p1730_p11 }
  0x13   : > { %1733 = dma.vmem_to_smem (!%p1731_p12), %s178_s7, 16, %s1863_s8, [#allocation4]  }
  0x14   : > { %1840 = dma.done.wait (%p1738_p9), [#allocation4], 16  }
  0x15   : > { %1842 = vsyncadd (%p1738_p9), [#allocation4], 4294967280 }
  0x16   : > { %223 = sfence }
  0x17   : > { %s1390_s9 = sshll.u32 %s1917_s22, 2  ;;  %v1677_v20 = vld [vmem:[%s2242_s3 + $0x38] sm:$0xff]  ;;  %vm314_vm0 = vcmask 130048   ;;  %v1676_v31 = vld [vmem:[%s2242_s3 + $0x30] sm:$0xff]  ;;  %v1675_v33 = vld [vmem:[%s2242_s3 + $0x28] sm:$0xff]  ;;  %s293_s25 = sld [smem:[#allocation2]] }
  0x18   : > { %p254_p13 = scmp.lt.s32.totalorder %s1390_s9, 7  ;;  %v1674_v34 = vld [vmem:[%s2242_s3 + $0x20] sm:$0xff]  ;;  %v1673_v35 = vld [vmem:[%s2242_s3 + $0x18] sm:$0xff]  ;;  %v1672_v37 = vld [vmem:[%s2242_s3 + $0x10] sm:$0xff]  ;;  %s1448_s7 = sld [smem:[#allocation2 + $0x1]] }
  0x19   : > { %v1671_v38 = vld [vmem:[%s2242_s3 + $0x8] sm:$0xff]  ;;  %v1670_v39 = vld [vmem:[%s2242_s3] sm:$0xff]  ;;  %s1518_s11 = sld [smem:[#allocation2 + $0x2]]  ;;  %s1715_s30 = sshll.u32 %s1917_s22, 6 }
  0x1a   : > { %s2252_s9 = smov (!%p254_p13, %s1390_s9), 7  ;;  %s1588_s15 = sld [smem:[#allocation2 + $0x3]] }
  0x1b   : > { %s1664_s10 = sshll.u32 %s2252_s9, 4  ;;  %s1665_s14 = sshll.u32 %s2252_s9, 3 }
  0x1c   : > { %s258_s13 = scalar_lea.vmem %s2240_s1, %s1664_s10  ;;  %s1967_s17 = scalar_lea.vmem %s2241_s2, %s1665_s14 }
  0x1d   : > { %v269_v0 = vld [vmem:[%s258_s13] sm:$0xff]  ;;  %v270_v1 = vld [vmem:[%s258_s13 + $0x8] sm:$0xff]  ;;  %v1952_v4 = vld [vmem:[%s258_s13 + $0x10] sm:$0xff]  ;;  %v294_v41 = vstv %s293_s25  ;;  %s1293_s8 = scalar_lea.hbm %s2244_s5, %s1715_s30 }
  0x1e   : > { %v285_v2 = vpack.c.bf16 %v269_v0, %v269_v0  ;;  %v286_v3 = vpack.c.bf16 %v270_v1, %v270_v1  ;;  %v1954_v5 = vld [vmem:[%s258_s13 + $0x18] sm:$0xff]  ;;  %v287_v6 = vpack.c.bf16 %v1952_v4, %v1952_v4  ;;  %v1960_v8 = vld [vmem:[%s258_s13 + $0x20] sm:$0xff]  ;;  %v1962_v9 = vld [vmem:[%s258_s13 + $0x28] sm:$0xff]  ;;  %v295_v42 = vmul.f32 %v294_v41, %v269_v0  ;;  %s1296_s10 = sshll.u32 %s1293_s8, 4  ;;  %s1297_s10 = int_to_ptr.hbm [resolvable:$true] %s1296_s10 }
  0x1f   : > { %v288_v7 = vpack.c.bf16 %v1954_v5, %v1954_v5  ;;  %v289_v12 = vpack.c.bf16 %v1960_v8, %v1960_v8  ;;  %v290_v13 = vpack.c.bf16 %v1962_v9, %v1962_v9  ;;  %v1973_v14 = vld [vmem:[%s258_s13 + $0x30] sm:$0xff]  ;;  %v1975_v15 = vld [vmem:[%s258_s13 + $0x38] sm:$0xff]  ;;  %v1666_v24 = vld [vmem:[%s1967_s17] sm:$0xff]  ;;  %v296_v43 = vmul.f32 %v294_v41, %v270_v1  ;;  %s1809_s12 = sshra.s32 %s1297_s10, 4  ;;  %s1810_s12 = int_to_ptr.hbm [resolvable:$true] %s1809_s12 }
  0x20   : > { %v310_v10 = vunpack.c.l.b16 %v285_v2  ;;  %v311_v11 = vunpack.c.l.b16 %v286_v3  ;;  %v339_v16 = vunpack.c.l.b16 %v287_v6  ;;  %v291_v18 = vpack.c.bf16 %v1973_v14, %v1973_v14  ;;  %v1667_v28 = vld [vmem:[%s1967_s17 + $0x8] sm:$0xff]  ;;  %v1669_v32 = vld [vmem:[%s1967_s17 + $0x18] sm:$0xff]  ;;  %v1668_v36 = vld [vmem:[%s1967_s17 + $0x10] sm:$0xff]  ;;  %s1811_s22 = scalar_lea.hbm %s1810_s12, 64  ;;  %p1816_p3 = scmp.lt.s32.totalorder %s1810_s12, %s2244_s5 }
  0x21   : > { %v340_v17 = vunpack.c.l.b16 %v288_v7  ;;  %v292_v19 = vpack.c.bf16 %v1975_v15, %v1975_v15  ;;  %v367_v22 = vunpack.c.l.b16 %v289_v12  ;;  %v368_v23 = vunpack.c.l.b16 %v290_v13  ;;  %p1812_p0 = scmp.ne.s32.totalorder %s1810_s12, %s1811_s22 }
  0x22   : > { %v312_v21 = vpack.c.b16 %v311_v11, %v310_v10  ;;  %v395_v26 = vunpack.c.l.b16 %v291_v18  ;;  %v297_v50 = vmul.f32 %v294_v41, %v1952_v4  ;;  %v298_v51 = vmul.f32 %v294_v41, %v1954_v5  ;;  %v1776_v5 = vld [vmem:[%s2243_s4] ss:$0 sm:$0xff] }
  0x23   : > { %v341_v25 = vpack.c.b16 %v340_v17, %v339_v16  ;;  %v396_v27 = vunpack.c.l.b16 %v292_v19  ;;  %v369_v29 = vpack.c.b16 %v368_v23, %v367_v22  ;;  %v299_v56 = vmul.f32 %v294_v41, %v1960_v8  ;;  %v1678_v18 = vld [vmem:[%s1967_s17] sm:$0xff]  ;;  %p1813_p1 = pnand %p1812_p0, %p1934_p5 }
  0x24   : > { %325 = vmatpush.bf16.msra.mxu0 %v312_v21  ;;  %v300_v57 = vmul.f32 %v294_v41, %v1962_v9  ;;  %v301_v63 = vmul.f32 %v294_v41, %v1973_v14  ;;  %v302_v0 = vmul.f32 %v294_v41, %v1975_v15 }
  0x25   : > { %353 = vmatpush.bf16.msra.mxu1 %v341_v25  ;;  %v397_v30 = vpack.c.b16 %v396_v27, %v395_v26  ;;  %p1814_p2 = pneg %p1813_p1 }
  0x27   : > { %1400 = vmatmul.msk.bf16.vlgmr.msra.gmra.mxu0 %vm314_vm0, %v1666_v24  ;;  %409 = vmatpush.bf16.msra.mxu3 %v397_v30  ;;  %v1679_v30 = vld [vmem:[%s1967_s17 + $0x8] sm:$0xff] }
  0x28   : > { %488 = vmatpush.bf16.msrb.mxu0 %v1677_v20  ;;  %1405 = vmatmul.msk.bf16.vlgmr.msra.gmra.mxu1 %vm314_vm0, %v1667_v28 }
  0x29   : > { %381 = vmatpush.bf16.msrb.mxu1 %v369_v29 }
  0x2a   : > { %1415 = vmatmul.msk.bf16.vlgmr.msra.gmra.mxu3 %vm314_vm0, %v1669_v32  ;;  %v1689_v32 = vld [vmem:[%s2242_s3 + $0x78] sm:$0xff] }
  0x2c   : > { %489 = vmatpush.bf16.msrb.mxu0 %v1676_v31 }
  0x30   : > { %490 = vmatpush.bf16.msrb.mxu0 %v1675_v33 }
  0x34   : > { %491 = vmatpush.bf16.msrb.mxu0 %v1674_v34 }
  0x38   : > { %492 = vmatpush.bf16.msrb.mxu0 %v1673_v35  ;;  %1410 = vmatmul.msk.bf16.vlgmr.msrb.gmra.mxu1 %vm314_vm0, %v1668_v36  ;;  %v1688_v35 = vld [vmem:[%s2242_s3 + $0x70] sm:$0xff] }
  0x3c   : > { %493 = vmatpush.bf16.msrb.mxu0 %v1672_v37 }
  0x40   : > { %494 = vmatpush.bf16.msrb.mxu0 %v1671_v38 }
  0x44   : > { %495 = vmatpush.bf16.msrb.mxu0 %v1670_v39  ;;  %v1687_v39 = vld [vmem:[%s2242_s3 + $0x68] sm:$0xff] }
  0x48   : > { %737 = vmatpush.bf16.msra.mxu0 %v1689_v32 }
  0x4c   : > { %738 = vmatpush.bf16.msra.mxu0 %v1688_v35 }
  0x50   : > { %739 = vmatpush.bf16.msra.mxu0 %v1687_v39 }
  0xa4   : > { %v327_v40 = vpop.f32.mrf.mxu0 }
  0xa5   : > { %v355_v44 = vpop.f32.mrf.mxu1  ;;  %v328_v46 = vadd.f32 %v327_v40, %v295_v42 }
  0xa6   : > { %v356_v52 = vadd.f32 %v355_v44, %v297_v50  ;;  %v1686_v44 = vld [vmem:[%s2242_s3 + $0x60] sm:$0xff] }
  0xa7   : > { %740 = vmatpush.bf16.msra.mxu0 %v1686_v44 }
  0xac   : > { %v329_v45 = vpop.f32.mrf.mxu0 }
  0xad   : > { %v330_v47 = vadd.f32 %v329_v45, %v296_v43  ;;  %v357_v49 = vpop.f32.mrf.mxu1  ;;  %v411_v61 = vpop.f32.mrf.mxu3 }
  0xae   : > { %v358_v53 = vadd.f32 %v357_v49, %v298_v51  ;;  %v412_v2 = vadd.f32 %v411_v61, %v301_v63  ;;  %v1682_v61 = vld [vmem:[%s2242_s3 + $0x40] sm:$0xff]  ;;  %v542_v63 = vstv %s1448_s7 }
  0xaf   : > { %v416_v48 = vpack.c.bf16 %v330_v47, %v328_v46  ;;  %v1680_v46 = vld [vmem:[%s1967_s17 + $0x10] sm:$0xff] }
  0xb0   : > { %v417_v55 = vpack.c.bf16 %v358_v53, %v356_v52 }
  0xb1   : > { %496 = vmatmul.bf16.vlgmr.msrb.gmra.mxu0 %v416_v48  ;;  %v1685_v48 = vld [vmem:[%s2242_s3 + $0x58] sm:$0xff] }
  0xb2   : > { %741 = vmatpush.bf16.msra.mxu0 %v1685_v48 }
  0xb5   : > { %v383_v54 = vpop.f32.mrf.mxu1  ;;  %v413_v1 = vpop.f32.mrf.mxu3 }
  0xb6   : > { %v384_v59 = vadd.f32 %v383_v54, %v299_v56  ;;  %v414_v3 = vadd.f32 %v413_v1, %v302_v0 }
  0xb8   : > { %v419_v4 = vpack.c.bf16 %v414_v3, %v412_v2 }
  0xbd   : > { %v385_v58 = vpop.f32.mrf.mxu1 }
  0xbe   : > { %v386_v60 = vadd.f32 %v385_v58, %v300_v57  ;;  %v1681_v58 = vld [vmem:[%s1967_s17 + $0x18] sm:$0xff] }
  0xc0   : > { %v418_v62 = vpack.c.bf16 %v386_v60, %v384_v59  ;;  %v1684_v59 = vld [vmem:[%s2242_s3 + $0x50] sm:$0xff]  ;;  %v1683_v60 = vld [vmem:[%s2242_s3 + $0x48] sm:$0xff] }
  0xc1   : > { %501 = vmatmul.bf16.gmra.mxu0 %v417_v55 }
  0xc2   : > { %742 = vmatpush.bf16.msra.mxu0 %v1684_v59 }
  0xc6   : > { %743 = vmatpush.bf16.msra.mxu0 %v1683_v60 }
  0xca   : > { %744 = vmatpush.bf16.msra.mxu0 %v1682_v61 }
  0xd1   : > { %506 = vmatmul.bf16.gmra.mxu0 %v418_v62 }
  0xe1   : > { %511 = vmatmul.bf16.gmra.mxu0 %v419_v4 }
 0x12e   : > { %v497_v6 = vpop.f32.mrf.mxu0 }
 0x12f   : > { %v498_v7 = vadd.f32 %v1776_v5, %v497_v6 }
 0x131   : > { %v2022_v8 = vmax.f32 %v498_v7, 0.0 }
 0x133   : > { %v533_v11 = vpack.c.bf16 %v2022_v8, %v2022_v8  ;;  %v543_v0 = vmul.f32 %v542_v63, %v2022_v8 }
 0x135   : > { %v558_v14 = vunpack.c.l.b16 %v533_v11 }
 0x136   : > { %v499_v9 = vpop.f32.mrf.mxu0 }
 0x137   : > { %v500_v10 = vadd.f32 %v1776_v5, %v499_v9 }
 0x139   : > { %v2026_v12 = vmax.f32 %v500_v10, 0.0 }
 0x13b   : > { %v534_v13 = vpack.c.bf16 %v2026_v12, %v2026_v12  ;;  %v544_v1 = vmul.f32 %v542_v63, %v2026_v12 }
 0x13d   : > { %v559_v15 = vunpack.c.l.b16 %v534_v13 }
 0x13e   : > { %v502_v16 = vpop.f32.mrf.mxu0 }
 0x13f   : > { %v560_v17 = vpack.c.b16 %v559_v15, %v558_v14  ;;  %v503_v19 = vadd.f32 %v1776_v5, %v502_v16 }
 0x141   : > { %572 = vmatpush.bf16.msra.mxu1 %v560_v17  ;;  %v2032_v20 = vmax.f32 %v503_v19, 0.0 }
 0x143   : > { %v535_v24 = vpack.c.bf16 %v2032_v20, %v2032_v20  ;;  %v545_v7 = vmul.f32 %v542_v63, %v2032_v20 }
 0x144   : > { %1453 = vmatmul.msk.bf16.vlgmr.msra.gmra.mxu1 %vm314_vm0, %v1678_v18 }
 0x145   : > { %v586_v26 = vunpack.c.l.b16 %v535_v24 }
 0x146   : > { %v504_v21 = vpop.f32.mrf.mxu0 }
 0x147   : > { %v505_v22 = vadd.f32 %v1776_v5, %v504_v21 }
 0x149   : > { %v2034_v23 = vmax.f32 %v505_v22, 0.0 }
 0x14b   : > { %v536_v25 = vpack.c.bf16 %v2034_v23, %v2034_v23  ;;  %v546_v9 = vmul.f32 %v542_v63, %v2034_v23 }
 0x14d   : > { %v587_v27 = vunpack.c.l.b16 %v536_v25 }
 0x14e   : > { %v507_v28 = vpop.f32.mrf.mxu0 }
 0x14f   : > { %v588_v29 = vpack.c.b16 %v587_v27, %v586_v26  ;;  %v508_v31 = vadd.f32 %v1776_v5, %v507_v28  ;;  %v1777_v27 = vld [vmem:[%s2243_s4 + $0x1] ss:$0 sm:$0xff] }
 0x151   : > { %600 = vmatpush.bf16.msra.mxu2 %v588_v29  ;;  %v2045_v33 = vmax.f32 %v508_v31, 0.0 }
 0x153   : > { %v537_v37 = vpack.c.bf16 %v2045_v33, %v2045_v33  ;;  %v547_v8 = vmul.f32 %v542_v63, %v2045_v33 }
 0x154   : > { %1458 = vmatmul.msk.bf16.vlgmr.msra.gmra.mxu2 %vm314_vm0, %v1679_v30 }
 0x155   : > { %1716 = vmatpush.bf16.msrb.mxu2 %v1689_v32  ;;  %v614_v41 = vunpack.c.l.b16 %v537_v37 }
 0x156   : > { %v509_v34 = vpop.f32.mrf.mxu0 }
 0x157   : > { %v510_v36 = vadd.f32 %v1776_v5, %v509_v34 }
 0x159   : > { %v522_v38 = vmax.f32 %v510_v36, 0.0  ;;  %1717 = vmatpush.bf16.msrb.mxu2 %v1688_v35 }
 0x15b   : > { %v538_v40 = vpack.c.bf16 %v522_v38, %v522_v38  ;;  %v548_v16 = vmul.f32 %v542_v63, %v522_v38 }
 0x15d   : > { %v615_v42 = vunpack.c.l.b16 %v538_v40  ;;  %1718 = vmatpush.bf16.msrb.mxu2 %v1687_v39  ;;  %v1690_v39 = vld [vmem:[%s1967_s17] sm:$0xff] }
 0x15e   : > { %v512_v43 = vpop.f32.mrf.mxu0 }
 0x15f   : > { %v616_v45 = vpack.c.b16 %v615_v42, %v614_v41  ;;  %v513_v47 = vadd.f32 %v1776_v5, %v512_v43 }
 0x161   : > { %628 = vmatpush.bf16.msrb.mxu3 %v616_v45  ;;  %1719 = vmatpush.bf16.msrb.mxu2 %v1686_v44  ;;  %v523_v49 = vmax.f32 %v513_v47, 0.0 }
 0x163   : > { %v539_v52 = vpack.c.bf16 %v523_v49, %v523_v49  ;;  %v549_v22 = vmul.f32 %v542_v63, %v523_v49 }
 0x164   : > { %1463 = vmatmul.msk.bf16.vlgmr.msrb.gmra.mxu3 %vm314_vm0, %v1680_v46 }
 0x165   : > { %1720 = vmatpush.bf16.msrb.mxu2 %v1685_v48  ;;  %v642_v55 = vunpack.c.l.b16 %v539_v52  ;;  %v1691_v52 = vld [vmem:[%s1967_s17 + $0x8] sm:$0xff] }
 0x166   : > { %v514_v50 = vpop.f32.mrf.mxu0 }
 0x167   : > { %v515_v51 = vadd.f32 %v1776_v5, %v514_v50 }
 0x169   : > { %v524_v53 = vmax.f32 %v515_v51, 0.0  ;;  %1721 = vmatpush.bf16.msrb.mxu2 %v1684_v59 }
 0x16b   : > { %v540_v54 = vpack.c.bf16 %v524_v53, %v524_v53  ;;  %v550_v24 = vmul.f32 %v542_v63, %v524_v53  ;;  %v1701_v63 = vld [vmem:[%s2242_s3 + $0xb8] sm:$0xff] }
 0x16d   : > { %v643_v56 = vunpack.c.l.b16 %v540_v54  ;;  %1722 = vmatpush.bf16.msrb.mxu2 %v1683_v60 }
 0x16f   : > { %v644_v57 = vpack.c.b16 %v643_v56, %v642_v55 }
 0x171   : > { %656 = vmatpush.bf16.msrb.mxu1 %v644_v57  ;;  %1723 = vmatpush.bf16.msrb.mxu2 %v1682_v61 }
 0x174   : > { %1468 = vmatmul.msk.bf16.vlgmr.msrb.gmra.mxu1 %vm314_vm0, %v1681_v58 }
 0x1c1   : > { %v574_v62 = vpop.f32.mrf.mxu1 }
 0x1c2   : > { %v575_v3 = vadd.f32 %v574_v62, %v543_v0 }
 0x1c9   : > { %v576_v2 = vpop.f32.mrf.mxu1 }
 0x1ca   : > { %v577_v4 = vadd.f32 %v576_v2, %v544_v1  ;;  %v1692_v1 = vld [vmem:[%s1967_s17 + $0x10] sm:$0xff] }
 0x1cc   : > { %v663_v5 = vpack.c.bf16 %v577_v4, %v575_v3  ;;  %v1700_v3 = vld [vmem:[%s2242_s3 + $0xb0] sm:$0xff] }
 0x1ce   : > { %745 = vmatmul.bf16.vlgmr.msra.gmra.mxu0 %v663_v5 }
 0x1d7   : > { %v602_v6 = vpop.f32.mrf.mxu2 }
 0x1d8   : > { %v603_v11 = vadd.f32 %v602_v6, %v545_v7  ;;  %v1699_v6 = vld [vmem:[%s2242_s3 + $0xa8] sm:$0xff] }
 0x1df   : > { %v604_v10 = vpop.f32.mrf.mxu2 }
 0x1e0   : > { %v605_v13 = vadd.f32 %v604_v10, %v546_v9 }
 0x1e2   : > { %v664_v14 = vpack.c.bf16 %v605_v13, %v603_v11  ;;  %v1698_v11 = vld [vmem:[%s2242_s3 + $0xa0] sm:$0xff] }
 0x1e4   : > { %750 = vmatmul.bf16.vlgmr.msrb.gmra.mxu2 %v664_v14 }
 0x1e7   : > { %v630_v15 = vpop.f32.mrf.mxu3 }
 0x1e8   : > { %v631_v17 = vadd.f32 %v630_v15, %v547_v8  ;;  %v1697_v8 = vld [vmem:[%s2242_s3 + $0x98] sm:$0xff] }
 0x1ef   : > { %v632_v12 = vpop.f32.mrf.mxu3 }
 0x1f0   : > { %v633_v18 = vadd.f32 %v632_v12, %v548_v16  ;;  %v1693_v12 = vld [vmem:[%s1967_s17 + $0x18] sm:$0xff] }
 0x1f1   : > { %v658_v19 = vpop.f32.mrf.mxu1 }
 0x1f2   : > { %v665_v21 = vpack.c.bf16 %v633_v18, %v631_v17  ;;  %v659_v25 = vadd.f32 %v658_v19, %v549_v22  ;;  %v1696_v17 = vld [vmem:[%s2242_s3 + $0x90] sm:$0xff]  ;;  %v1695_v18 = vld [vmem:[%s2242_s3 + $0x88] sm:$0xff]  ;;  %v1694_v19 = vld [vmem:[%s2242_s3 + $0x80] sm:$0xff]  ;;  %v791_v22 = vstv %s1518_s11 }
 0x1f4   : > { %755 = vmatmul.bf16.gmra.mxu2 %v665_v21 }
 0x1f9   : > { %v660_v20 = vpop.f32.mrf.mxu1 }
 0x1fa   : > { %v661_v23 = vadd.f32 %v660_v20, %v550_v24 }
 0x1fc   : > { %v666_v26 = vpack.c.bf16 %v661_v23, %v659_v25 }
 0x204   : > { %760 = vmatmul.bf16.gmra.mxu2 %v666_v26 }
 0x24b   : > { %v746_v28 = vpop.f32.mrf.mxu0 }
 0x24c   : > { %v747_v29 = vadd.f32 %v1777_v27, %v746_v28 }
 0x24e   : > { %v2082_v30 = vmax.f32 %v747_v29, 0.0 }
 0x250   : > { %v782_v33 = vpack.c.bf16 %v2082_v30, %v2082_v30  ;;  %v792_v24 = vmul.f32 %v791_v22, %v2082_v30 }
 0x252   : > { %v807_v36 = vunpack.c.l.b16 %v782_v33 }
 0x253   : > { %v748_v31 = vpop.f32.mrf.mxu0 }
 0x254   : > { %v749_v32 = vadd.f32 %v1777_v27, %v748_v31 }
 0x256   : > { %v2086_v34 = vmax.f32 %v749_v32, 0.0 }
 0x258   : > { %v783_v35 = vpack.c.bf16 %v2086_v34, %v2086_v34  ;;  %v793_v20 = vmul.f32 %v791_v22, %v2086_v34 }
 0x25a   : > { %v808_v37 = vunpack.c.l.b16 %v783_v35 }
 0x25c   : > { %v809_v38 = vpack.c.b16 %v808_v37, %v807_v36 }
 0x25e   : > { %821 = vmatpush.bf16.msra.mxu3 %v809_v38 }
 0x261   : > { %1523 = vmatmul.msk.bf16.vlgmr.msra.gmra.mxu3 %vm314_vm0, %v1690_v39 }
 0x267   : > { %v751_v40 = vpop.f32.mrf.mxu2 }
 0x268   : > { %v752_v41 = vadd.f32 %v1777_v27, %v751_v40 }
 0x26a   : > { %v2092_v42 = vmax.f32 %v752_v41, 0.0 }
 0x26c   : > { %v784_v45 = vpack.c.bf16 %v2092_v42, %v2092_v42  ;;  %v794_v29 = vmul.f32 %v791_v22, %v2092_v42 }
 0x26e   : > { %v835_v48 = vunpack.c.l.b16 %v784_v45 }
 0x26f   : > { %v753_v43 = vpop.f32.mrf.mxu2 }
 0x270   : > { %v754_v44 = vadd.f32 %v1777_v27, %v753_v43 }
 0x272   : > { %v2096_v46 = vmax.f32 %v754_v44, 0.0 }
 0x274   : > { %v785_v47 = vpack.c.bf16 %v2096_v46, %v2096_v46  ;;  %v795_v31 = vmul.f32 %v791_v22, %v2096_v46 }
 0x276   : > { %v836_v49 = vunpack.c.l.b16 %v785_v47 }
 0x277   : > { %v756_v50 = vpop.f32.mrf.mxu2 }
 0x278   : > { %v837_v51 = vpack.c.b16 %v836_v49, %v835_v48  ;;  %v757_v53 = vadd.f32 %v1777_v27, %v756_v50  ;;  %v1778_v49 = vld [vmem:[%s2243_s4 + $0x2] ss:$0 sm:$0xff] }
 0x27a   : > { %849 = vmatpush.bf16.msra.mxu1 %v837_v51  ;;  %v770_v54 = vmax.f32 %v757_v53, 0.0 }
 0x27c   : > { %v786_v57 = vpack.c.bf16 %v770_v54, %v770_v54  ;;  %v796_v38 = vmul.f32 %v791_v22, %v770_v54 }
 0x27d   : > { %1528 = vmatmul.msk.bf16.vlgmr.msra.gmra.mxu1 %vm314_vm0, %v1691_v52 }
 0x27e   : > { %v863_v60 = vunpack.c.l.b16 %v786_v57 }
 0x27f   : > { %v758_v55 = vpop.f32.mrf.mxu2 }
 0x280   : > { %v759_v56 = vadd.f32 %v1777_v27, %v758_v55 }
 0x282   : > { %v771_v58 = vmax.f32 %v759_v56, 0.0 }
 0x284   : > { %v787_v59 = vpack.c.bf16 %v771_v58, %v771_v58  ;;  %v797_v30 = vmul.f32 %v791_v22, %v771_v58 }
 0x286   : > { %v864_v61 = vunpack.c.l.b16 %v787_v59 }
 0x287   : > { %v761_v62 = vpop.f32.mrf.mxu2 }
 0x288   : > { %v865_v0 = vpack.c.b16 %v864_v61, %v863_v60  ;;  %v762_v2 = vadd.f32 %v1777_v27, %v761_v62  ;;  %v1702_v61 = vld [vmem:[%s1967_s17] sm:$0xff] }
 0x28a   : > { %877 = vmatpush.bf16.msrb.mxu3 %v865_v0  ;;  %v772_v4 = vmax.f32 %v762_v2, 0.0 }
 0x28c   : > { %v788_v9 = vpack.c.bf16 %v772_v4, %v772_v4  ;;  %v798_v44 = vmul.f32 %v791_v22, %v772_v4 }
 0x28d   : > { %1533 = vmatmul.msk.bf16.vlgmr.msrb.gmra.mxu3 %vm314_vm0, %v1692_v1 }
 0x28e   : > { %986 = vmatpush.bf16.msra.mxu3 %v1701_v63  ;;  %v891_v14 = vunpack.c.l.b16 %v788_v9 }
 0x28f   : > { %v763_v5 = vpop.f32.mrf.mxu2 }
 0x290   : > { %v764_v7 = vadd.f32 %v1777_v27, %v763_v5 }
 0x292   : > { %987 = vmatpush.bf16.msra.mxu3 %v1700_v3  ;;  %v773_v10 = vmax.f32 %v764_v7, 0.0 }
 0x294   : > { %v789_v13 = vpack.c.bf16 %v773_v10, %v773_v10  ;;  %v799_v45 = vmul.f32 %v791_v22, %v773_v10  ;;  %v1703_v10 = vld [vmem:[%s1967_s17 + $0x8] sm:$0xff] }
 0x296   : > { %988 = vmatpush.bf16.msra.mxu3 %v1699_v6  ;;  %v892_v15 = vunpack.c.l.b16 %v789_v13 }
 0x298   : > { %v893_v16 = vpack.c.b16 %v892_v15, %v891_v14  ;;  %v1713_v14 = vld [vmem:[%s2242_s3 + $0xf8] sm:$0xff] }
 0x299   : > { %1235 = vmatpush.bf16.msra.mxu2 %v1713_v14 }
 0x29a   : > { %989 = vmatpush.bf16.msra.mxu3 %v1698_v11  ;;  %905 = vmatpush.bf16.msrb.mxu1 %v893_v16  ;;  %v1712_v16 = vld [vmem:[%s2242_s3 + $0xf0] sm:$0xff] }
 0x29d   : > { %1538 = vmatmul.msk.bf16.vlgmr.msrb.gmra.mxu1 %vm314_vm0, %v1693_v12  ;;  %1236 = vmatpush.bf16.msra.mxu2 %v1712_v16 }
 0x29e   : > { %990 = vmatpush.bf16.msra.mxu3 %v1697_v8 }
 0x2a2   : > { %991 = vmatpush.bf16.msra.mxu3 %v1696_v17 }
 0x2a6   : > { %992 = vmatpush.bf16.msra.mxu3 %v1695_v18 }
 0x2aa   : > { %993 = vmatpush.bf16.msra.mxu3 %v1694_v19  ;;  %v1711_v19 = vld [vmem:[%s2242_s3 + $0xe8] sm:$0xff] }
 0x2ab   : > { %1237 = vmatpush.bf16.msra.mxu2 %v1711_v19 }
 0x2e4   : > { %v823_v21 = vpop.f32.mrf.mxu3 }
 0x2e5   : > { %v824_v23 = vadd.f32 %v823_v21, %v792_v24 }
 0x2ec   : > { %v825_v25 = vpop.f32.mrf.mxu3 }
 0x2ed   : > { %v826_v26 = vadd.f32 %v825_v25, %v793_v20  ;;  %v1710_v25 = vld [vmem:[%s2242_s3 + $0xe0] sm:$0xff] }
 0x2ee   : > { %1238 = vmatpush.bf16.msra.mxu2 %v1710_v25 }
 0x2ef   : > { %v912_v27 = vpack.c.bf16 %v826_v26, %v824_v23  ;;  %v1704_v26 = vld [vmem:[%s1967_s17 + $0x10] sm:$0xff] }
 0x2f1   : > { %994 = vmatmul.bf16.vlgmr.msra.gmra.mxu3 %v912_v27 }
 0x2fa   : > { %v851_v28 = vpop.f32.mrf.mxu1 }
 0x2fb   : > { %v852_v33 = vadd.f32 %v851_v28, %v794_v29  ;;  %v1709_v28 = vld [vmem:[%s2242_s3 + $0xd8] sm:$0xff] }
 0x2fc   : > { %1239 = vmatpush.bf16.msra.mxu2 %v1709_v28 }
 0x302   : > { %v853_v32 = vpop.f32.mrf.mxu1 }
 0x303   : > { %v854_v35 = vadd.f32 %v853_v32, %v795_v31 }
 0x305   : > { %v913_v36 = vpack.c.bf16 %v854_v35, %v852_v33 }
 0x307   : > { %999 = vmatmul.bf16.gmra.mxu3 %v913_v36 }
 0x310   : > { %v879_v37 = vpop.f32.mrf.mxu3 }
 0x311   : > { %v880_v34 = vadd.f32 %v879_v37, %v796_v38 }
 0x318   : > { %v881_v39 = vpop.f32.mrf.mxu3 }
 0x319   : > { %v882_v40 = vadd.f32 %v881_v39, %v797_v30  ;;  %v1705_v39 = vld [vmem:[%s1967_s17 + $0x18] sm:$0xff]  ;;  %s250_s17 = sand.u32 1, %s1853_s19  }
 0x31a   : > { %v907_v41 = vpop.f32.mrf.mxu1  ;;  %s1389_s25 = sshll.u32 %s250_s17, 6  ;;  %s1281_s11 = scalar_lea.sflag [#allocation3], %s250_s17 }
 0x31b   : > { %v914_v43 = vpack.c.bf16 %v882_v40, %v880_v34  ;;  %v908_v42 = vadd.f32 %v907_v41, %v798_v44  ;;  %v1708_v34 = vld [vmem:[%s2242_s3 + $0xd0] sm:$0xff]  ;;  %v1707_v40 = vld [vmem:[%s2242_s3 + $0xc8] sm:$0xff]  ;;  %v1706_v41 = vld [vmem:[%s2242_s3 + $0xc0] sm:$0xff]  ;;  %v1040_v44 = vstv %s1588_s15  ;;  %s2195_s26 = scalar_lea.vmem [#allocation5], %s1389_s25  ;;  %s1815_s15 = scalar_lea.hbm %s2244_s5, 128 }
 0x31c   : > { %1240 = vmatpush.bf16.msra.mxu2 %v1708_v34  ;;  %s1294_s9 = sshll.u32 %s2195_s26, 4  ;;  %p1817_p4 = scmp.lt.s32.totalorder %s1815_s15, %s1811_s22  ;;  %s1295_s9 = int_to_ptr.vmem [resolvable:$true] %s1294_s9 }
 0x31d   : > { %1004 = vmatmul.bf16.gmra.mxu3 %v914_v43 }
 0x31e   : > { %p1818_p7 = por %p1817_p4, %p1816_p3 }
 0x320   : > { %1241 = vmatpush.bf16.msra.mxu2 %v1707_v40  ;;  %p1819_p8 = pnand %p1818_p7, %p1814_p2 }
 0x322   : > { %v909_v47 = vpop.f32.mrf.mxu1 }
 0x323   : > { %v910_v46 = vadd.f32 %v909_v47, %v799_v45 }
 0x324   : > { %1242 = vmatpush.bf16.msra.mxu2 %v1706_v41 }
 0x325   : > { %v915_v48 = vpack.c.bf16 %v910_v46, %v908_v42 }
 0x32d   : > { %1009 = vmatmul.bf16.gmra.mxu3 %v915_v48 }
 0x374   : > { %v995_v50 = vpop.f32.mrf.mxu3 }
 0x375   : > { %v996_v51 = vadd.f32 %v1778_v49, %v995_v50 }
 0x377   : > { %v2137_v52 = vmax.f32 %v996_v51, 0.0 }
 0x379   : > { %v1031_v55 = vpack.c.bf16 %v2137_v52, %v2137_v52  ;;  %v1041_v45 = vmul.f32 %v1040_v44, %v2137_v52 }
 0x37b   : > { %v1056_v58 = vunpack.c.l.b16 %v1031_v55 }
 0x37c   : > { %v997_v53 = vpop.f32.mrf.mxu3 }
 0x37d   : > { %v998_v54 = vadd.f32 %v1778_v49, %v997_v53 }
 0x37f   : > { %v2141_v56 = vmax.f32 %v998_v54, 0.0 }
 0x381   : > { %v1032_v57 = vpack.c.bf16 %v2141_v56, %v2141_v56  ;;  %v1042_v47 = vmul.f32 %v1040_v44, %v2141_v56 }
 0x383   : > { %v1057_v59 = vunpack.c.l.b16 %v1032_v57 }
 0x385   : > { %v1058_v60 = vpack.c.b16 %v1057_v59, %v1056_v58 }
 0x387   : > { %1070 = vmatpush.bf16.msra.mxu1 %v1058_v60 }
 0x38a   : > { %v1000_v62 = vpop.f32.mrf.mxu3  ;;  %1593 = vmatmul.msk.bf16.vlgmr.msra.gmra.mxu1 %vm314_vm0, %v1702_v61 }
 0x38b   : > { %v1001_v63 = vadd.f32 %v1778_v49, %v1000_v62 }
 0x38d   : > { %v2147_v0 = vmax.f32 %v1001_v63, 0.0 }
 0x38f   : > { %v1033_v3 = vpack.c.bf16 %v2147_v0, %v2147_v0  ;;  %v1043_v51 = vmul.f32 %v1040_v44, %v2147_v0 }
 0x391   : > { %v1084_v6 = vunpack.c.l.b16 %v1033_v3 }
 0x392   : > { %v1002_v1 = vpop.f32.mrf.mxu3 }
 0x393   : > { %v1003_v2 = vadd.f32 %v1778_v49, %v1002_v1 }
 0x395   : > { %v2151_v4 = vmax.f32 %v1003_v2, 0.0 }
 0x397   : > { %v1034_v5 = vpack.c.bf16 %v2151_v4, %v2151_v4  ;;  %v1044_v53 = vmul.f32 %v1040_v44, %v2151_v4 }
 0x399   : > { %v1085_v7 = vunpack.c.l.b16 %v1034_v5 }
 0x39b   : > { %v1086_v9 = vpack.c.b16 %v1085_v7, %v1084_v6  ;;  %v1779_v7 = vld [vmem:[%s2243_s4 + $0x3] ss:$0 sm:$0xff] }
 0x39d   : > { %1098 = vmatpush.bf16.msrb.mxu0 %v1086_v9 }
 0x3a0   : > { %v1005_v11 = vpop.f32.mrf.mxu3  ;;  %1598 = vmatmul.msk.bf16.vlgmr.msrb.gmra.mxu0 %vm314_vm0, %v1703_v10 }
 0x3a1   : > { %v1006_v13 = vadd.f32 %v1778_v49, %v1005_v11 }
 0x3a3   : > { %v1019_v15 = vmax.f32 %v1006_v13, 0.0 }
 0x3a5   : > { %v1035_v17 = vpack.c.bf16 %v1019_v15, %v1019_v15  ;;  %v1045_v52 = vmul.f32 %v1040_v44, %v1019_v15 }
 0x3a7   : > { %v1112_v22 = vunpack.c.l.b16 %v1035_v17 }
 0x3a8   : > { %v1007_v8 = vpop.f32.mrf.mxu3 }
 0x3a9   : > { %v1008_v12 = vadd.f32 %v1778_v49, %v1007_v8 }
 0x3ab   : > { %v1020_v18 = vmax.f32 %v1008_v12, 0.0 }
 0x3ad   : > { %v1036_v21 = vpack.c.bf16 %v1020_v18, %v1020_v18  ;;  %v1046_v60 = vmul.f32 %v1040_v44, %v1020_v18 }
 0x3af   : > { %v1113_v24 = vunpack.c.l.b16 %v1036_v21 }
 0x3b0   : > { %v1010_v20 = vpop.f32.mrf.mxu3 }
 0x3b1   : > { %v1114_v23 = vpack.c.b16 %v1113_v24, %v1112_v22  ;;  %v1011_v27 = vadd.f32 %v1778_v49, %v1010_v20 }
 0x3b3   : > { %1126 = vmatpush.bf16.msrb.mxu1 %v1114_v23  ;;  %v1021_v29 = vmax.f32 %v1011_v27, 0.0 }
 0x3b5   : > { %v1037_v33 = vpack.c.bf16 %v1021_v29, %v1021_v29  ;;  %v1047_v2 = vmul.f32 %v1040_v44, %v1021_v29 }
 0x3b6   : > { %1603 = vmatmul.msk.bf16.vlgmr.msrb.gmra.mxu1 %vm314_vm0, %v1704_v26 }
 0x3b7   : > { %v1140_v37 = vunpack.c.l.b16 %v1037_v33 }
 0x3b8   : > { %v1012_v31 = vpop.f32.mrf.mxu3 }
 0x3b9   : > { %v1013_v32 = vadd.f32 %v1778_v49, %v1012_v31 }
 0x3bb   : > { %v1022_v35 = vmax.f32 %v1013_v32, 0.0 }
 0x3bd   : > { %v1038_v36 = vpack.c.bf16 %v1022_v35, %v1022_v35  ;;  %v1048_v0 = vmul.f32 %v1040_v44, %v1022_v35 }
 0x3bf   : > { %v1141_v38 = vunpack.c.l.b16 %v1038_v36 }
 0x3c1   : > { %v1142_v30 = vpack.c.b16 %v1141_v38, %v1140_v37 }
 0x3c3   : > { %1154 = vmatpush.bf16.msra.mxu0 %v1142_v30 }
 0x3c6   : > { %1608 = vmatmul.msk.bf16.vlgmr.msra.gmra.mxu0 %vm314_vm0, %v1705_v39 }
 0x407   : > { %v1072_v43 = vpop.f32.mrf.mxu1 }
 0x408   : > { %v1073_v46 = vadd.f32 %v1072_v43, %v1041_v45 }
 0x40f   : > { %v1074_v42 = vpop.f32.mrf.mxu1 }
 0x410   : > { %v1075_v48 = vadd.f32 %v1074_v42, %v1042_v47 }
 0x412   : > { %v1161_v49 = vpack.c.bf16 %v1075_v48, %v1073_v46 }
 0x414   : > { %1243 = vmatmul.bf16.vlgmr.msra.gmra.mxu2 %v1161_v49 }
 0x41d   : > { %v1100_v50 = vpop.f32.mrf.mxu0 }
 0x41e   : > { %v1101_v55 = vadd.f32 %v1100_v50, %v1043_v51 }
 0x425   : > { %v1102_v54 = vpop.f32.mrf.mxu0 }
 0x426   : > { %v1103_v57 = vadd.f32 %v1102_v54, %v1044_v53 }
 0x428   : > { %v1162_v58 = vpack.c.bf16 %v1103_v57, %v1101_v55 }
 0x42a   : > { %1248 = vmatmul.bf16.gmra.mxu2 %v1162_v58 }
 0x433   : > { %v1128_v59 = vpop.f32.mrf.mxu1 }
 0x434   : > { %v1129_v61 = vadd.f32 %v1128_v59, %v1045_v52 }
 0x43b   : > { %v1130_v56 = vpop.f32.mrf.mxu1 }
 0x43c   : > { %v1131_v62 = vadd.f32 %v1130_v56, %v1046_v60 }
 0x43e   : > { %v1163_v63 = vpack.c.bf16 %v1131_v62, %v1129_v61 }
 0x440   : > { %1253 = vmatmul.bf16.gmra.mxu2 %v1163_v63 }
 0x443   : > { %v1156_v1 = vpop.f32.mrf.mxu0 }
 0x444   : > { %v1157_v4 = vadd.f32 %v1156_v1, %v1047_v2 }
 0x44b   : > { %v1158_v3 = vpop.f32.mrf.mxu0 }
 0x44c   : > { %v1159_v5 = vadd.f32 %v1158_v3, %v1048_v0 }
 0x44e   : > { %v1164_v6 = vpack.c.bf16 %v1159_v5, %v1157_v4 }
 0x450   : > { %1258 = vmatmul.bf16.gmra.mxu2 %v1164_v6 }
 0x497   : > { %v1244_v9 = vpop.f32.mrf.mxu2 }
 0x498   : > { %v1245_v10 = vadd.f32 %v1779_v7, %v1244_v9 }
 0x49a   : > { %v1264_v11 = vmax.f32 %v1245_v10, 0.0 }
 0x49c   : > { %1272 = vst [vmem:[%s2195_s26] sm:$0xff] %v1264_v11 }
 0x49f   : > { %v1246_v13 = vpop.f32.mrf.mxu2 }
 0x4a0   : > { %v1247_v14 = vadd.f32 %v1779_v7, %v1246_v13 }
 0x4a2   : > { %v1265_v15 = vmax.f32 %v1247_v14, 0.0 }
 0x4a4   : > { %1273 = vst [vmem:[%s2195_s26 + $0x8] sm:$0xff] %v1265_v15 }
 0x4ad   : > { %v1249_v8 = vpop.f32.mrf.mxu2 }
 0x4ae   : > { %v1250_v16 = vadd.f32 %v1779_v7, %v1249_v8 }
 0x4b0   : > { %v1266_v12 = vmax.f32 %v1250_v16, 0.0 }
 0x4b2   : > { %1274 = vst [vmem:[%s2195_s26 + $0x10] sm:$0xff] %v1266_v12 }
 0x4b5   : > { %v1251_v17 = vpop.f32.mrf.mxu2 }
 0x4b6   : > { %v1252_v18 = vadd.f32 %v1779_v7, %v1251_v17 }
 0x4b8   : > { %v1267_v19 = vmax.f32 %v1252_v18, 0.0 }
 0x4ba   : > { %1275 = vst [vmem:[%s2195_s26 + $0x18] sm:$0xff] %v1267_v19 }
 0x4c3   : > { %v1254_v21 = vpop.f32.mrf.mxu2 }
 0x4c4   : > { %v1255_v22 = vadd.f32 %v1779_v7, %v1254_v21 }
 0x4c6   : > { %v1268_v24 = vmax.f32 %v1255_v22, 0.0 }
 0x4c8   : > { %1276 = vst [vmem:[%s2195_s26 + $0x20] sm:$0xff] %v1268_v24 }
 0x4cb   : > { %v1256_v20 = vpop.f32.mrf.mxu2 }
 0x4cc   : > { %v1257_v25 = vadd.f32 %v1779_v7, %v1256_v20 }
 0x4ce   : > { %v1269_v23 = vmax.f32 %v1257_v25, 0.0 }
 0x4d0   : > { %1277 = vst [vmem:[%s2195_s26 + $0x28] sm:$0xff] %v1269_v23 }
 0x4d3   : > { %v1259_v26 = vpop.f32.mrf.mxu2 }
 0x4d4   : > { %v1260_v27 = vadd.f32 %v1779_v7, %v1259_v26 }
 0x4d6   : > { %v1270_v28 = vmax.f32 %v1260_v27, 0.0 }
 0x4d8   : > { %1278 = vst [vmem:[%s2195_s26 + $0x30] sm:$0xff] %v1270_v28 }
 0x4db   : > { %v1261_v29 = vpop.f32.mrf.mxu2 }
 0x4dc   : > { %v1262_v31 = vadd.f32 %v1779_v7, %v1261_v29 }
 0x4de   : > { %v1271_v32 = vmax.f32 %v1262_v31, 0.0 }
 0x4e0   : > { %1279 = vst [vmem:[%s2195_s26 + $0x38] sm:$0xff] %v1271_v32 }
 0x4e1   : > { %1822 = shalt.err (!%p1819_p8)
}
 0x4e2   : > { %s1864_s17 = smov 128   ;;  %s1865_s25 = smov 8  }
 0x4e3   : > { %1728 = dma.vmem_to_hbm [thread:$0]  (%p1934_p5), %s1295_s9, 1024, %s1297_s10, %s1281_s11, %s1864_s17, %s1864_s17, %s1865_s25  }
 0x4e4 PF: > { %p1740_p9 = scmp.ge.s32.totalorder %s1861_s21, 2  ;;  %s1311_s26 = sand.u32 1, %s1849_s18  }
 0x4e5   : > { %s1312_s30 = scalar_lea.sflag [#allocation3], %s1311_s26 }
 0x4e6   : > { %p1735_p10 = pnand %p1740_p9, %p1938_p6 }
 0x4e8   : > { %p1736_p11 = pneg %p1735_p10 }
 0x4ea   : > { %1844 = dma.done.wait (%p1736_p11), %s1312_s30, 1024  }
 0x4eb   : > { %1846 = vsyncadd (%p1736_p11), %s1312_s30, 4294966272  ;;  %p16_p12 = scmp.ge.s32.totalorder %s1921_s24, 4   ;;  %s2247_s18 = smov %s1853_s19 }
 0x4ec   : > { %s2248_s19 = smov %s1857_s20  ;;  %s2249_s20 = smov %s1932_s27 }
 0x4ed   : > { %s2250_s21 = smov %s1921_s24  ;;  %18 = sbr.rel (!%p16_p12) target bundleno = 4 (0x4), region = 89 }
 0x4f2   :  { %1318 = vsyncpa [#allocation3], 1 }
 0x4f3   :  { %1320 = vsyncpa [#allocation3 + $0x1], 1 }
 0x4f4   :  { %1321 = vsyncpa [#allocation4], 1 }
 0x4f5   :  { %1323 = vsyncpa [#allocation4 + $0x1], 1 }

</bundles_post_ra>
